<compile_context>
chip_gen: v7x
topology: tpu7x:2x2x1
jax: 0.10.0
libtpu: 0.0.40
codegen_flags: <defaults>
</compile_context>

<pallas_src>
import jax
import jax.numpy as jnp
from jax.experimental import pallas as pl
from jax.experimental.pallas import tpu as pltpu

ALPHA = 0.2          # LeakyReLU negative slope
NEG_FILL = -9.0e15   # same constant as the PyTorch module


def ggann_kernel(wh_ref, hb_ref, f1_ref, f2_ref, adjb_ref, wi_ref, whh_ref, b_ref, out_ref):
    """One row-block of nodes: masked softmax attention, h' = att @ Wh, GRUCell update."""
    Fp = hb_ref.shape[1]
    bf = jnp.bfloat16

    # --- attention logits: e_ij = LeakyReLU(f1_i + f2_j) + mask_bias_ij -------------
    e = f1_ref[...] + f2_ref[...]                       # (TM,1) + (1,N) -> (TM,N) f32
    e = jnp.maximum(e, ALPHA * e)                       # LeakyReLU (max form)
    att = e + adjb_ref[...].astype(jnp.float32)         # additive mask (0 / -9e15)

    # --- row-wise softmax (dim=1), stabilized; reciprocal runs on the EUP -----------
    att = jnp.exp(att - jnp.max(att, axis=1, keepdims=True))
    att = att * pl.reciprocal(jnp.sum(att, axis=1, keepdims=True), approx=True)
    # TODO(synk): nn.Dropout(0.2) on the attention matrix omitted (inference semantics).

    # --- h_prime = att @ Wh (bf16 MXU operands, f32 accumulation) -------------------
    h_prime = jnp.dot(att.astype(bf), wh_ref[...], preferred_element_type=jnp.float32)

    # --- GRUCell(out_features, out_features): gru(h_prime, h_blk), gate order [r,z,n]
    h_blk = hb_ref[...]                                  # (TM, Fp) f32 GRU state
    gi = jnp.dot(h_prime.astype(bf), wi_ref[...],
                 preferred_element_type=jnp.float32) + b_ref[0:1, :]
    gh = jnp.dot(h_blk.astype(bf), whh_ref[...],
                 preferred_element_type=jnp.float32) + b_ref[1:2, :]

    rz = jax.nn.sigmoid(gi[:, :2 * Fp] + gh[:, :2 * Fp])   # fused r/z gates (one EUP pass)
    r = rz[:, :Fp]
    z = rz[:, Fp:]
    n = jnp.tanh(gi[:, 2 * Fp:] + r * gh[:, 2 * Fp:])
    out_ref[...] = (1.0 - z) * n + z * h_blk


# ---------------- wrapper: packing / padding / precompute / pallas_call -------------

def _pad_gates(wcat, F, Fp, pad_rows):
    """Pad a gate-concatenated (R, 3F) array to (R+pad_rows, 3Fp), per gate block."""
    blocks = []
    for g in range(3):
        blk = wcat[:, g * F:(g + 1) * F]
        blocks.append(jnp.pad(blk, ((0, pad_rows), (0, Fp - F))))
    return jnp.concatenate(blocks, axis=1)


def _vmem_limit_bytes():
    # v5e/v6e: 128 MiB VMEM per TensorCore; v7x: 64 MiB.  Leave headroom for
    # compiler-internal scratch (matters most on v7x).
    try:
        cap = pltpu.get_tpu_info().vmem_capacity_bytes
    except Exception:
        cap = 64 * 1024 * 1024
    return int(min(96 * 1024 * 1024, cap * 6 // 10))


def ggann_forward(h, adj, params):
    N, F = h.shape
    assert adj.shape == (N, N)
    bf = jnp.bfloat16

    # Lane-dense feature axis: pad F up to a multiple of 128 (min 128) so the output
    # tile and every GRU gate slice is a full lane tile.  Padded lanes (all-zero
    # weights/inputs) are sliced off at the end and never affect the real lanes.
    Fp = max(128, ((F + 127) // 128) * 128)
    padF = Fp - F

    h_p = jnp.pad(h, ((0, 0), (0, padF))).astype(jnp.float32)           # (N, Fp)
    W_p = jnp.pad(params["W"], ((0, padF), (0, padF)))                  # (Fp, Fp)
    A_p = jnp.pad(params["A"], ((0, padF), (0, 0)))                     # (Fp, 2)
    wi_p = _pad_gates(params["Wi_cat"], F, Fp, padF).astype(bf)         # (Fp, 3Fp)
    whh_p = _pad_gates(params["Wh_cat"], F, Fp, padF).astype(bf)        # (Fp, 3Fp)
    bias = jnp.concatenate([_pad_gates(params["b_i"], F, Fp, 0),
                            _pad_gates(params["b_h"], F, Fp, 0)],
                           axis=0).astype(jnp.float32)                  # (2, 3Fp)

    # --- hoisted, grid-invariant precompute (was redone once per row block) ---------
    wh = jnp.dot(h_p.astype(bf), W_p.astype(bf), preferred_element_type=jnp.float32)  # (N, Fp)
    f = jnp.dot(wh.astype(bf), A_p.astype(bf), preferred_element_type=jnp.float32)    # (N, 2)
    f1 = f[:, 0:1]                              # (N, 1)  row attention term (blocked)
    f2 = jnp.transpose(f[:, 1:2])               # (1, N)  column attention term (lane-major)
    wh_b = wh.astype(bf)                         # (N, Fp) bf16 keys/values

    # Additive mask bias in bf16 (add instead of compare+select; halves N^2 DMA vs f32).
    adj_bias = jnp.where(adj > 0, 0.0, NEG_FILL).astype(bf)
    # TODO(synk): on v5e with very large N, an int8/packed mask would halve the
    #             adjacency stream again (HBM-roofline regime).

    # --- row-block size: prefer >=2 blocks so both v7x TensorCores get work ---------
    TM = N
    for cand in (256, 128, 64, 32, 16, 8):
        if N % cand == 0 and N // cand >= 2:
            TM = cand
            break
    grid = (N // TM,)
    # TODO(synk): for N large enough that a (TM, N) attention row no longer fits v7x's
    #             64 MiB VMEM, add a second "arbitrary" key-axis grid dim with an
    #             online (flash-style) softmax.
    # TODO(synk): mark grid-invariant inputs pipeline_mode=pl.Buffered(1) to skip the
    #             redundant second buffer once single-buffered pipelining is robust.

    nblk = N // TM
    flops = 2 * N * N * Fp + 4 * N * Fp * 3 * Fp + 8 * N * N
    transcendentals = N * N + 3 * N * Fp + nblk * TM
    bytes_accessed = (N * N * 2 + N * Fp * 2 + 2 * N * Fp * 4
                      + 2 * Fp * 3 * Fp * 2 + 2 * 3 * Fp * 4 + 2 * N * 4)

    grid_spec = pltpu.PrefetchScalarGridSpec(
        num_scalar_prefetch=0,
        grid=grid,
        in_specs=[
            pl.BlockSpec((N, Fp), lambda i: (0, 0)),        # Wh (bf16, keys/values)
            pl.BlockSpec((TM, Fp), lambda i: (i, 0)),       # h row block (GRU state, f32)
            pl.BlockSpec((TM, 1), lambda i: (i, 0)),        # f1 row attention term
            pl.BlockSpec((1, N), lambda i: (0, 0)),         # f2 column attention term
            pl.BlockSpec((TM, N), lambda i: (i, 0)),        # additive adjacency bias (bf16)
            pl.BlockSpec((Fp, 3 * Fp), lambda i: (0, 0)),   # [Wir | Wiz | Win] bf16
            pl.BlockSpec((Fp, 3 * Fp), lambda i: (0, 0)),   # [Whr | Whz | Whn] bf16
            pl.BlockSpec((2, 3 * Fp), lambda i: (0, 0)),    # [b_ih ; b_hh] f32
        ],
        out_specs=pl.BlockSpec((TM, Fp), lambda i: (i, 0)),
    )

    out_p = pl.pallas_call(
        ggann_kernel,
        out_shape=jax.ShapeDtypeStruct((N, Fp), jnp.float32),
        grid_spec=grid_spec,
        compiler_params=pltpu.CompilerParams(
            dimension_semantics=("parallel",),
            vmem_limit_bytes=_vmem_limit_bytes(),
        ),
        cost_estimate=pl.CostEstimate(
            flops=int(flops),
            transcendentals=int(transcendentals),
            bytes_accessed=int(bytes_accessed),
        ),
    )(wh_b, h_p, f1, f2, adj_bias, wi_p, whh_p, bias)

    return out_p[:, :F]


# ---------------- parameter init (deterministic, mirrors nn.Module shapes) ----------

def xavier_uniform(key, shape, gain):
    fan_in, fan_out = shape
    limit = gain * (6.0 / (fan_in + fan_out)) ** 0.5
    return jax.random.uniform(key, shape, jnp.float32, -limit, limit)


def init_params(key, in_features, out_features):
    assert in_features == out_features, "gru(h_prime, h) requires in_features == out_features"
    F = out_features
    ks = jax.random.split(key, 6)
    W = xavier_uniform(ks[0], (in_features, F), 1.414)
    a = xavier_uniform(ks[1], (2 * F, 1), 1.414)
    A = jnp.concatenate([a[:F, :], a[F:, :]], axis=1)                 # (F, 2) = [a1 | a2]

    # GRUCell default init: U(-1/sqrt(hidden), 1/sqrt(hidden)); gate order [r, z, n]
    k = 1.0 / (F ** 0.5)
    w_ih = jax.random.uniform(ks[2], (3 * F, F), jnp.float32, -k, k)
    w_hh = jax.random.uniform(ks[3], (3 * F, F), jnp.float32, -k, k)
    b_ih = jax.random.uniform(ks[4], (3 * F,), jnp.float32, -k, k)
    b_hh = jax.random.uniform(ks[5], (3 * F,), jnp.float32, -k, k)

    # pre-transposed & gate-concatenated so the kernel computes x @ W_cat
    Wi_cat = jnp.concatenate([w_ih[0:F].T, w_ih[F:2 * F].T, w_ih[2 * F:].T], axis=1)  # (F, 3F)
    Wh_cat = jnp.concatenate([w_hh[0:F].T, w_hh[F:2 * F].T, w_hh[2 * F:].T], axis=1)  # (F, 3F)
    b_i = b_ih.reshape(1, 3 * F)
    b_h = b_hh.reshape(1, 3 * F)
    return dict(W=W, A=A, Wi_cat=Wi_cat, Wh_cat=Wh_cat, b_i=b_i, b_h=b_h)


# ---------------- reference (matches kernel's bf16-operand / f32-accumulate math) ----

def ggann_ref(h, adj, p):
    bf = jnp.bfloat16
    F = h.shape[1]
    Wh = jnp.dot(h.astype(bf), p["W"].astype(bf), preferred_element_type=jnp.float32)
    f = jnp.dot(Wh.astype(bf), p["A"].astype(bf), preferred_element_type=jnp.float32)
    e = f[:, 0:1] + f[:, 1:2].T
    e = jnp.where(e > 0, e, ALPHA * e)
    att = jnp.where(adj > 0, e, NEG_FILL)
    att = jax.nn.softmax(att, axis=1)
    h_prime = jnp.dot(att.astype(bf), Wh.astype(bf), preferred_element_type=jnp.float32)
    gi = jnp.dot(h_prime.astype(bf), p["Wi_cat"].astype(bf),
                 preferred_element_type=jnp.float32) + p["b_i"]
    gh = jnp.dot(h.astype(bf), p["Wh_cat"].astype(bf),
                 preferred_element_type=jnp.float32) + p["b_h"]
    r = jax.nn.sigmoid(gi[:, :F] + gh[:, :F])
    z = jax.nn.sigmoid(gi[:, F:2 * F] + gh[:, F:2 * F])
    n = jnp.tanh(gi[:, 2 * F:] + r * gh[:, 2 * F:])
    return (1.0 - z) * n + z * h


if __name__ == "__main__":
    N, F = 16, 32                     # 16 nodes, in_features = out_features = 32
    key = jax.random.PRNGKey(0)
    k_h, k_adj, k_p = jax.random.split(key, 3)

    h = jax.random.normal(k_h, (N, F), jnp.float32)
    adj = (jax.random.uniform(k_adj, (N, N)) > 0.5).astype(jnp.float32)
    adj = jnp.maximum(adj, jnp.eye(N, dtype=jnp.float32))   # self-loops
    params = init_params(k_p, F, F)

    out = jax.block_until_ready(ggann_forward(h, adj, params))
    ref = ggann_ref(h, adj, params)

    assert out.shape == (N, F)
    err = float(jnp.max(jnp.abs(out - ref)))
    assert jnp.allclose(out, ref, atol=2e-2, rtol=2e-2), err
    print("KERNEL_OK")
</pallas_src>

<mosaic_0001>
module attributes {stable_mosaic.version = 11 : i64} {
  func.func @ggann_kernel(%arg0: i32, %arg1: memref<16x128xbf16, #tpu.memory_space<vmem>>, %arg2: memref<8x128xf32, #tpu.memory_space<vmem>>, %arg3: memref<8x1xf32, #tpu.memory_space<vmem>>, %arg4: memref<1x16xf32, #tpu.memory_space<vmem>>, %arg5: memref<8x16xbf16, #tpu.memory_space<vmem>>, %arg6: memref<128x384xbf16, #tpu.memory_space<vmem>>, %arg7: memref<128x384xbf16, #tpu.memory_space<vmem>>, %arg8: memref<2x384xf32, #tpu.memory_space<vmem>>, %arg9: memref<8x128xf32, #tpu.memory_space<vmem>>) attributes {dimension_semantics = [#tpu.dimension_semantics<parallel>], iteration_bounds = array<i64: 2>, scalar_prefetch = 0 : i64, scratch_operands = 0 : i64, tpu.core_type = #tpu.core_type<tc>, window_params = [{pipeline_mode = #tpu.pipeline_mode<synchronous>, transform_indices = @transform_0, window_bounds = array<i64: 16, 128>}, {transform_indices = @transform_1, window_bounds = array<i64: 8, 128>}, {transform_indices = @transform_2, window_bounds = array<i64: 8, 1>}, {pipeline_mode = #tpu.pipeline_mode<synchronous>, transform_indices = @transform_3, window_bounds = array<i64: 1, 16>}, {transform_indices = @transform_4, window_bounds = array<i64: 8, 16>}, {pipeline_mode = #tpu.pipeline_mode<synchronous>, transform_indices = @transform_5, window_bounds = array<i64: 128, 384>}, {pipeline_mode = #tpu.pipeline_mode<synchronous>, transform_indices = @transform_6, window_bounds = array<i64: 128, 384>}, {pipeline_mode = #tpu.pipeline_mode<synchronous>, transform_indices = @transform_7, window_bounds = array<i64: 2, 384>}, {transform_indices = @transform_8, window_bounds = array<i64: 8, 128>}]} {
    %c0 = arith.constant 0 : index
    %c0_0 = arith.constant 0 : index
    %0 = vector.load %arg3[%c0, %c0_0] : memref<8x1xf32, #tpu.memory_space<vmem>>, vector<8x1xf32>
    %c0_1 = arith.constant 0 : index
    %c0_2 = arith.constant 0 : index
    %1 = vector.load %arg4[%c0_1, %c0_2] : memref<1x16xf32, #tpu.memory_space<vmem>>, vector<1x16xf32>
    %2 = vector.broadcast %0 : vector<8x1xf32> to vector<8x16xf32>
    %3 = vector.broadcast %1 : vector<1x16xf32> to vector<8x16xf32>
    %4 = arith.addf %2, %3 : vector<8x16xf32>
    %cst = arith.constant 2.000000e-01 : f32
    %5 = vector.broadcast %cst : f32 to vector<8x16xf32>
    %6 = arith.mulf %5, %4 : vector<8x16xf32>
    %7 = arith.maximumf %4, %6 : vector<8x16xf32>
    %c0_3 = arith.constant 0 : index
    %c0_4 = arith.constant 0 : index
    %8 = vector.load %arg5[%c0_3, %c0_4] : memref<8x16xbf16, #tpu.memory_space<vmem>>, vector<8x16xbf16>
    %9 = arith.extf %8 : vector<8x16xbf16> to vector<8x16xf32>
    %10 = arith.addf %7, %9 : vector<8x16xf32>
    %cst_5 = arith.constant dense<0xFF800000> : vector<8xf32>
    %11 = vector.multi_reduction <maximumf>, %10, %cst_5 [1] : vector<8x16xf32> to vector<8xf32>
    %12 = vector.shape_cast %11 : vector<8xf32> to vector<8x1xf32>
    %13 = vector.broadcast %12 : vector<8x1xf32> to vector<8x16xf32>
    %14 = arith.subf %10, %13 : vector<8x16xf32>
    %15 = math.exp %14 : vector<8x16xf32>
    %cst_6 = arith.constant dense<0.000000e+00> : vector<8xf32>
    %16 = vector.multi_reduction <add>, %15, %cst_6 [1] : vector<8x16xf32> to vector<8xf32>
    %17 = vector.shape_cast %16 : vector<8xf32> to vector<8x1xf32>
    %18 = tpu.reciprocal %17 {approx = true} : vector<8x1xf32> -> vector<8x1xf32>
    %19 = vector.broadcast %18 : vector<8x1xf32> to vector<8x16xf32>
    %20 = arith.mulf %15, %19 : vector<8x16xf32>
    %21 = arith.truncf %20 : vector<8x16xf32> to vector<8x16xbf16>
    %c0_7 = arith.constant 0 : index
    %c0_8 = arith.constant 0 : index
    %22 = vector.load %arg1[%c0_7, %c0_8] : memref<16x128xbf16, #tpu.memory_space<vmem>>, vector<16x128xbf16>
    %cst_9 = arith.constant dense<0.000000e+00> : vector<8x128xf32>
    %23 = tpu.matmul %21, %22, %cst_9 {dimension_numbers = #tpu.dot_dimension_numbers<[1], [0], [0], [1], [0, 0, 1, 1], [], []>} : vector<8x16xbf16>, vector<16x128xbf16>, vector<8x128xf32> -> vector<8x128xf32>
    %c0_10 = arith.constant 0 : index
    %c0_11 = arith.constant 0 : index
    %24 = vector.load %arg2[%c0_10, %c0_11] : memref<8x128xf32, #tpu.memory_space<vmem>>, vector<8x128xf32>
    %25 = arith.truncf %23 : vector<8x128xf32> to vector<8x128xbf16>
    %c0_12 = arith.constant 0 : index
    %c0_13 = arith.constant 0 : index
    %26 = vector.load %arg6[%c0_12, %c0_13] : memref<128x384xbf16, #tpu.memory_space<vmem>>, vector<128x384xbf16>
    %cst_14 = arith.constant dense<0.000000e+00> : vector<8x384xf32>
    %27 = tpu.matmul %25, %26, %cst_14 {dimension_numbers = #tpu.dot_dimension_numbers<[1], [0], [0], [1], [0, 0, 1, 1], [], []>} : vector<8x128xbf16>, vector<128x384xbf16>, vector<8x384xf32> -> vector<8x384xf32>
    %c0_15 = arith.constant 0 : index
    %c0_16 = arith.constant 0 : index
    %28 = vector.load %arg8[%c0_15, %c0_16] : memref<2x384xf32, #tpu.memory_space<vmem>>, vector<1x384xf32>
    %29 = vector.broadcast %28 : vector<1x384xf32> to vector<8x384xf32>
    %30 = arith.addf %27, %29 : vector<8x384xf32>
    %31 = arith.truncf %24 : vector<8x128xf32> to vector<8x128xbf16>
    %c0_17 = arith.constant 0 : index
    %c0_18 = arith.constant 0 : index
    %32 = vector.load %arg7[%c0_17, %c0_18] : memref<128x384xbf16, #tpu.memory_space<vmem>>, vector<128x384xbf16>
    %cst_19 = arith.constant dense<0.000000e+00> : vector<8x384xf32>
    %33 = tpu.matmul %31, %32, %cst_19 {dimension_numbers = #tpu.dot_dimension_numbers<[1], [0], [0], [1], [0, 0, 1, 1], [], []>} : vector<8x128xbf16>, vector<128x384xbf16>, vector<8x384xf32> -> vector<8x384xf32>
    %c1 = arith.constant 1 : index
    %c0_20 = arith.constant 0 : index
    %34 = vector.load %arg8[%c1, %c0_20] : memref<2x384xf32, #tpu.memory_space<vmem>>, vector<1x384xf32>
    %35 = vector.broadcast %34 : vector<1x384xf32> to vector<8x384xf32>
    %36 = arith.addf %33, %35 : vector<8x384xf32>
    %37 = vector.extract_strided_slice %30 {offsets = [0, 0], sizes = [8, 256], strides = [1, 1]} : vector<8x384xf32> to vector<8x256xf32>
    %38 = vector.extract_strided_slice %36 {offsets = [0, 0], sizes = [8, 256], strides = [1, 1]} : vector<8x384xf32> to vector<8x256xf32>
    %39 = arith.addf %37, %38 : vector<8x256xf32>
    %40 = arith.negf %39 : vector<8x256xf32>
    %41 = math.exp %40 : vector<8x256xf32>
    %cst_21 = arith.constant 1.000000e+00 : f32
    %42 = vector.broadcast %cst_21 : f32 to vector<8x256xf32>
    %43 = arith.addf %42, %41 : vector<8x256xf32>
    %44 = arith.divf %42, %43 : vector<8x256xf32>
    %45 = vector.extract_strided_slice %44 {offsets = [0, 0], sizes = [8, 128], strides = [1, 1]} : vector<8x256xf32> to vector<8x128xf32>
    %46 = vector.extract_strided_slice %44 {offsets = [0, 128], sizes = [8, 128], strides = [1, 1]} : vector<8x256xf32> to vector<8x128xf32>
    %47 = vector.extract_strided_slice %30 {offsets = [0, 256], sizes = [8, 128], strides = [1, 1]} : vector<8x384xf32> to vector<8x128xf32>
    %48 = vector.extract_strided_slice %36 {offsets = [0, 256], sizes = [8, 128], strides = [1, 1]} : vector<8x384xf32> to vector<8x128xf32>
    %49 = arith.mulf %45, %48 : vector<8x128xf32>
    %50 = arith.addf %47, %49 : vector<8x128xf32>
    %51 = math.tanh %50 : vector<8x128xf32>
    %cst_22 = arith.constant 1.000000e+00 : f32
    %52 = vector.broadcast %cst_22 : f32 to vector<8x128xf32>
    %53 = arith.subf %52, %46 : vector<8x128xf32>
    %54 = arith.mulf %53, %51 : vector<8x128xf32>
    %55 = arith.mulf %46, %24 : vector<8x128xf32>
    %56 = arith.addf %54, %55 : vector<8x128xf32>
    %c0_23 = arith.constant 0 : index
    %c0_24 = arith.constant 0 : index
    %57 = vector.load %arg9[%c0_23, %c0_24] : memref<8x128xf32, #tpu.memory_space<vmem>>, vector<8x128xf32>
    tpu.vector_store %arg9[%c0_23, %c0_24], %56 {strides = array<i32>} : memref<8x128xf32, #tpu.memory_space<vmem>>, vector<8x128xf32>,
    return
  }
  func.func @transform_0(%arg0: i32) -> (i32, i32) {
    %c0_i32 = arith.constant 0 : i32
    %c0_i32_0 = arith.constant 0 : i32
    %c0_i32_1 = arith.constant 0 : i32
    return %c0_i32, %c0_i32_0 : i32, i32
  }
  func.func @transform_1(%arg0: i32) -> (i32, i32) {
    %c0_i32 = arith.constant 0 : i32
    %c0_i32_0 = arith.constant 0 : i32
    return %arg0, %c0_i32 : i32, i32
  }
  func.func @transform_2(%arg0: i32) -> (i32, i32) {
    %c0_i32 = arith.constant 0 : i32
    %c0_i32_0 = arith.constant 0 : i32
    return %arg0, %c0_i32 : i32, i32
  }
  func.func @transform_3(%arg0: i32) -> (i32, i32) {
    %c0_i32 = arith.constant 0 : i32
    %c0_i32_0 = arith.constant 0 : i32
    %c0_i32_1 = arith.constant 0 : i32
    return %c0_i32, %c0_i32_0 : i32, i32
  }
  func.func @transform_4(%arg0: i32) -> (i32, i32) {
    %c0_i32 = arith.constant 0 : i32
    %c0_i32_0 = arith.constant 0 : i32
    return %arg0, %c0_i32 : i32, i32
  }
  func.func @transform_5(%arg0: i32) -> (i32, i32) {
    %c0_i32 = arith.constant 0 : i32
    %c0_i32_0 = arith.constant 0 : i32
    %c0_i32_1 = arith.constant 0 : i32
    return %c0_i32, %c0_i32_0 : i32, i32
  }
  func.func @transform_6(%arg0: i32) -> (i32, i32) {
    %c0_i32 = arith.constant 0 : i32
    %c0_i32_0 = arith.constant 0 : i32
    %c0_i32_1 = arith.constant 0 : i32
    return %c0_i32, %c0_i32_0 : i32, i32
  }
  func.func @transform_7(%arg0: i32) -> (i32, i32) {
    %c0_i32 = arith.constant 0 : i32
    %c0_i32_0 = arith.constant 0 : i32
    %c0_i32_1 = arith.constant 0 : i32
    return %c0_i32, %c0_i32_0 : i32, i32
  }
  func.func @transform_8(%arg0: i32) -> (i32, i32) {
    %c0_i32 = arith.constant 0 : i32
    %c0_i32_0 = arith.constant 0 : i32
    return %arg0, %c0_i32 : i32, i32
  }
}

</mosaic_0001>

<bundles_post_ra>
// kernel: tpu_custom_call.1
= control target key start
LH: loop header
LB: loop body
LE: loop exit
PB: predicated region body
PF: predicated region fallthrough
CT: control target
= control target key end

     0   :  { %s1901_s0 = inlined_call_operand.hbm [shape: bf16[16,128], index: 0, kind: input, shape index: {}]   ;;  %s1902_s1 = inlined_call_operand.vmem [shape: f32[16,128], index: 1, kind: input, shape index: {}]   ;;  %s1903_s2 = inlined_call_operand.vmem [shape: f32[16,1], index: 2, kind: input, shape index: {}]   ;;  %s1904_s3 = inlined_call_operand.vmem [shape: f32[1,16], index: 3, kind: input, shape index: {}]   ;;  %s1905_s4 = inlined_call_operand.vmem [shape: bf16[16,16], index: 4, kind: input, shape index: {}]   ;;  %s1906_s5 = inlined_call_operand.hbm [shape: bf16[128,384], index: 5, kind: input, shape index: {}]   ;;  %s1907_s6 = inlined_call_operand.hbm [shape: bf16[128,384], index: 6, kind: input, shape index: {}]   ;;  %s1908_s7 = inlined_call_operand.vmem [shape: f32[2,384], index: 7, kind: input, shape index: {}]   ;;  %s1909_s8 = inlined_call_operand.hbm [shape: f32[16,128], index: 8, kind: output, shape index: {}]  }
   0x1   :  { %1918 = sst [smem:[#allocation15_spill]] %s1906_s5 }
   0x2   :  { %13 = vsyncpa [#allocation3], 0 }
   0x3   :  { %14 = vsyncpa [#allocation6], 0 }
   0x4   :  { %15 = vsyncpa [#allocation4], 0 }
   0x5   :  { %17 = vsyncpa [#allocation4 + $0x1], 0  ;;  %s1648_s27 = smov 0   ;;  %s1650_s28 = smov 0  }
   0x6   :  { %s1652_s29 = smov 0   ;;  %s1654_s30 = smov 0  }
   0x7 LB: > { %1919 = sst [smem:[#allocation12_spill]] %s1586_s29  ;;  %s1669_s9 = sadd.s32 4294967295, %s1590_s30   ;;  %s1590_s30 = sphi %s1654_s30, %s1937_s30   ;;  %s1586_s29 = sphi %s1652_s29, %s1939_s29   ;;  %s1582_s28 = sphi %s1650_s28, %s1941_s28   ;;  %s1578_s27 = sphi %s1648_s27, %s1940_s27  }
   0x8   : > { %s1133_s10 = sadd.s32 4294967294, %s1590_s30   ;;  %s1673_s11 = sadd.s32 1, %s1590_s30  }
   0x9   : > { %1920 = sst [smem:[#allocation13_spill]] %s1673_s11  ;;  %s213_s12 = sadd.s32 1, %s1586_s29 }
   0xa   : > { %s210_s13 = ssub.s32 %s1590_s30, %s1673_s11  ;;  %p223_p0 = scmp.ne.s32.totalorder %s1586_s29, %s1582_s28 }
   0xb   : > { %p211_p1 = scmp.eq.s32.totalorder %s210_s13, 0  ;;  %p224_p2 = scmp.eq.s32.totalorder %s1669_s9, 1 }
   0xc   : > { %p229_p3 = scmp.ne.s32.totalorder %s1582_s28, %s1578_s27  ;;  %p230_p4 = scmp.eq.s32.totalorder %s1133_s10, 1 }
   0xd   : > { %s1684_s14 = scalar_select %p211_p1, %s1586_s29, %s213_s12  }
   0xe   : > { %p1686_p5 = por %p224_p2, %p223_p0  ;;  %p1690_p6 = por %p230_p4, %p229_p3 }
   0xf   : > { %1921 = sst [smem:[#allocation14_spill]] %s1684_s14  ;;  %p1134_p7 = scmp.ge.s32.totalorder %s1590_s30, 1 }
  0x10   : > { %s1922_s15 = scalar_select %p1686_p5, 1, 0 }
  0x11   : > { %s1923_s16 = scalar_select %p1690_p6, 1, 0 }
  0x12   : > { %p237_p8 = scmp.lt.s32.totalorder %s1590_s30, 3  ;;  %p1910_p9 = scmp.eq.s32.totalorder %s1669_s9, 0 }
  0x13   : > { %s1592_s18 = smov [#allocation5]   ;;  %s1593_s21 = smov [#allocation2]  }
  0x14   : > { %p1697_p10 = pnand %p1134_p7, %p237_p8  ;;  %s265_s19 = sshll.u32 %s1592_s18, 4  ;;  %s266_s19 = int_to_ptr.vmem [resolvable:$true] %s265_s19 }
  0x15   : > { %s249_s22 = sshll.u32 %s1593_s21, 4  ;;  %s1926_s5 = sld [smem:[#allocation15_spill]]  ;;  %s1709_s22 = int_to_ptr.vmem [resolvable:$true] %s249_s22 }
  0x16   : > { %s1924_s17 = scalar_select %p1697_p10, 1, 0 }
  0x17   : > { %p1293_p11 = pneg %p1697_p10 }
  0x19   : > { %p1705_p12 = pnand %p1910_p9, %p1293_p11 }
  0x1b   : > { %s1436_s25 = scalar_lea.hbm %s1926_s5, 3072  ;;  %p1719_p0 = pneg %p1705_p12 }
  0x1c   : > { %p1437_p13 = scmp.ne.s32.totalorder %s1926_s5, %s1436_s25  ;;  %p1443_p3 = scmp.lt.u32.totalorder %s1436_s25, %s1926_s5 }
  0x1e   : > { %p1439_p1 = pnand %p1719_p0, %p1437_p13 }
  0x20   : > { %p1440_p2 = pneg %p1439_p1 }
  0x22   : > { %p1445_p4 = pnand %p1443_p3, %p1440_p2 }
  0x24   : > { %1448 = shalt.err (!%p1445_p4)
}
  0x25   : > { %s1449_s21 = scalar_lea.vmem %s266_s19, 3072  ;;  %p1457_p9 = scmp.lt.s32.totalorder %s266_s19, %s266_s19 }
  0x26   : > { %p1450_p7 = scmp.ne.s32.totalorder %s266_s19, %s1449_s21  ;;  %p1458_p6 = scmp.lt.s32.totalorder %s1449_s21, %s1449_s21 }
  0x28   : > { %p1452_p8 = pnand %p1450_p7, %p1719_p0  ;;  %p1459_p5 = por %p1458_p6, %p1457_p9 }
  0x2a   : > { %p1453_p11 = pneg %p1452_p8 }
  0x2c   : > { %p1460_p10 = pnand %p1459_p5, %p1453_p11 }
  0x2e   : > { %1463 = shalt.err (!%p1460_p10)
}
  0x2f   : > { %s1916_s23 = smov 192   ;;  %s1917_s24 = smov 12  }
  0x30   : > { %1299 = dma.hbm_to_vmem [thread:$0]  (!%p1705_p12), %s1926_s5, 3072, %s266_s19, [#allocation6], %s1916_s23, %s1916_s23, %s1917_s24  }
  0x31   : > { %s1464_s18 = scalar_lea.hbm %s1901_s0, 128 }
  0x32   : > { %p1465_p5 = scmp.ne.s32.totalorder %s1901_s0, %s1464_s18  ;;  %p1471_p10 = scmp.lt.u32.totalorder %s1464_s18, %s1901_s0 }
  0x34   : > { %p1467_p6 = pnand %p1465_p5, %p1719_p0 }
  0x36   : > { %p1468_p9 = pneg %p1467_p6 }
  0x38   : > { %p1473_p13 = pnand %p1471_p10, %p1468_p9 }
  0x3a   : > { %1476 = shalt.err (!%p1473_p13)
}
  0x3b   : > { %s1477_s19 = scalar_lea.vmem %s1709_s22, 128  ;;  %p1485_p4 = scmp.lt.s32.totalorder %s1709_s22, %s1709_s22 }
  0x3c   : > { %p1478_p1 = scmp.ne.s32.totalorder %s1709_s22, %s1477_s19  ;;  %p1486_p7 = scmp.lt.s32.totalorder %s1477_s19, %s1477_s19 }
  0x3e   : > { %p1480_p2 = pnand %p1478_p1, %p1719_p0  ;;  %p1487_p8 = por %p1486_p7, %p1485_p4 }
  0x40   : > { %p1481_p3 = pneg %p1480_p2 }
  0x42   : > { %p1488_p11 = pnand %p1487_p8, %p1481_p3 }
  0x44   : > { %1491 = shalt.err (!%p1488_p11)
}
  0x45   : > { %s1596_s14 = smov 64   ;;  %s1597_s29 = smov 4  }
  0x46   : > { %1296 = dma.hbm_to_vmem [thread:$0]  (!%p1705_p12), %s1901_s0, 128, %s1709_s22, [#allocation3], %s1596_s14, %s1596_s14, %s1597_s29  }
  0x47   : > { %s1598_s26 = smov [#allocation7]   ;;  %s1492_s21 = scalar_lea.hbm %s1907_s6, 3072 }
  0x48   : > { %s278_s10 = sshll.u32 %s1598_s26, 4  ;;  %p1493_p5 = scmp.ne.s32.totalorder %s1907_s6, %s1492_s21  ;;  %s279_s10 = int_to_ptr.vmem [resolvable:$true] %s278_s10 }
  0x49   : > { %p1499_p10 = scmp.lt.u32.totalorder %s1492_s21, %s1907_s6 }
  0x4a   : > { %p1495_p6 = pnand %p1493_p5, %p1719_p0 }
  0x4c   : > { %p1496_p9 = pneg %p1495_p6 }
  0x4e   : > { %p1501_p13 = pnand %p1499_p10, %p1496_p9 }
  0x50   : > { %1504 = shalt.err (!%p1501_p13)
}
  0x51   : > { %s1505_s22 = scalar_lea.vmem %s279_s10, 3072  ;;  %p1513_p4 = scmp.lt.s32.totalorder %s279_s10, %s279_s10 }
  0x52   : > { %p1506_p1 = scmp.ne.s32.totalorder %s279_s10, %s1505_s22  ;;  %p1514_p7 = scmp.lt.s32.totalorder %s1505_s22, %s1505_s22 }
  0x54   : > { %p1508_p2 = pnand %p1506_p1, %p1719_p0  ;;  %p1515_p8 = por %p1514_p7, %p1513_p4 }
  0x56   : > { %p1509_p3 = pneg %p1508_p2 }
  0x58   : > { %p1516_p11 = pnand %p1515_p8, %p1509_p3 }
  0x5a   : > { %1519 = shalt.err (!%p1516_p11)
}
  0x5b   : > { %s1928_s23 = smov 12   ;;  %s1929_s14 = smov 192  }
  0x5c   : > { %1302 = dma.hbm_to_vmem [thread:$0]  (!%p1705_p12), %s1907_s6, 3072, %s279_s10, [#allocation6], %s1929_s14, %s1929_s14, %s1928_s23  }
  0x5d   : > { %p1930_p5 = scmp.ne.s32.totalorder %s1924_s17, 0 }
  0x5e   : > { %p1931_p0 = scmp.eq.s32.totalorder (!%p1930_p5), %s1669_s9, 0 }
  0x5f   : > { %318 = sbr.rel (%p1930_p5) target bundleno = 1084 (0x43c), region = 52 }
  0x66   : > { %1565 = dma.done.wait (%p1931_p0), [#allocation3], 128   ;;  %p1932_p6 = pmov %p1931_p0 }
  0x67   : > { %p1933_p9 = pmov %p1931_p0 }
  0x68   : > { %1567 = vsyncadd (%p1932_p6), [#allocation3], 4294967168 }
  0x69   : > { %1569 = dma.done.wait (%p1933_p9), [#allocation6], 6144   ;;  %p1934_p10 = pmov %p1931_p0 }
  0x6a   : > { %p367_p13 = scmp.lt.s32.totalorder %s1669_s9, 1  ;;  %v1599_v0 = vmov 0   ;;  %v1147_v2 = vld [vmem:[%s1904_s3] ss:$0 sm:$0xff]  ;;  %vm399_vm0 = vcmask 130048   ;;  %v1600_v17 = vmov 0.0  }
  0x6b   : > { %1571 = vsyncadd (%p1934_p10), [#allocation6], 4294961152  ;;  %1356 = vset.pattern.permute.xlu0 %v1599_v0  ;;  %674 = vmatprep.mubr.bf16.mxu1 %v1599_v0  ;;  %v1357_v16 = vld [vmem:[#allocation2] sm:$0xff]   ;;  %vm1601_vm1 = vmmov 0   ;;  %v1358_v18 = vld [vmem:[#allocation5 + $0x4] ss:$12 sps:$4 sm:$0xff]  }
  0x6c   : > { %s1796_s17 = scalar_select %p367_p13, %s1669_s9, 1  ;;  %1225 = vmatprep.subr.bf16.mxu0 %v1600_v17  ;;  %1227 = vmatprep.mubr.msk.bf16.mxu0 %vm1601_vm1, %v1600_v17  ;;  %v1360_v19 = vld [vmem:[#allocation5] ss:$12 sps:$4 sm:$0xff]   ;;  %v1362_v20 = vld [vmem:[#allocation5 + $0x1c] ss:$12 sps:$4 sm:$0xff]  }
  0x6d   : > { %1226 = vmatpush3.bf16.msra.mxu0 %v1357_v16  ;;  %642 = vmatprep.subr.bf16.mxu1 %v1358_v18  ;;  %v1364_v21 = vld [vmem:[#allocation5 + $0x18] ss:$12 sps:$4 sm:$0xff]   ;;  %v1366_v22 = vld [vmem:[#allocation5 + $0x34] ss:$12 sps:$4 sm:$0xff]   ;;  %v1368_v23 = vld [vmem:[#allocation5 + $0x30] ss:$12 sps:$4 sm:$0xff]   ;;  %v499_v18 = vlaneseq }
  0x6e   : > { %s1144_s20 = sshll.u32 %s1796_s17, 3  ;;  %s1146_s25 = sshll.u32 %s1796_s17, 2  ;;  %1231 = vmatprep.subr.bf16.mxu0 %v1600_v17  ;;  %643 = vmatpush1.bf16.msra.mxu1 %v1360_v19  ;;  %v1370_v24 = vld [vmem:[#allocation5 + $0x4c] ss:$12 sps:$4 sm:$0xff]   ;;  %v1372_v25 = vld [vmem:[#allocation5 + $0x48] ss:$12 sps:$4 sm:$0xff]  }
  0x6f   : > { %s374_s11 = scalar_lea.vmem %s1903_s2, %s1144_s20  ;;  %s378_s13 = scalar_lea.vmem %s1905_s4, %s1146_s25  ;;  %644 = vmatprep.subr.bf16.mxu1 %v1362_v20  ;;  %v1374_v26 = vld [vmem:[#allocation5 + $0x64] ss:$12 sps:$4 sm:$0xff]   ;;  %v1376_v27 = vld [vmem:[#allocation5 + $0x60] ss:$12 sps:$4 sm:$0xff]   ;;  %v1378_v28 = vld [vmem:[#allocation5 + $0x7c] ss:$12 sps:$4 sm:$0xff]  }
  0x70   : > { %v380_v1 = vld [vmem:[%s374_s11] sm:$0xff]  ;;  %v1382_v30 = vld [vmem:[#allocation5 + $0x94] ss:$12 sps:$4 sm:$0xff]   ;;  %v1392_v46 = vld [vmem:[#allocation7 + $0x4] ss:$12 sps:$4 sm:$0xff]   ;;  %s370_s23 = scalar_lea.vmem %s1902_s1, %s1144_s20  ;;  %v500_v19 = vshrl.u32 %v499_v18, 7 }
  0x71   : > { %384 = vperm.xlu0 %1356, %v380_v1   ;;  %v396_v4 = vld [vmem:[%s378_s13] sm:$0xf]  ;;  %v1384_v31 = vld [vmem:[#allocation5 + $0x90] ss:$12 sps:$4 sm:$0xff]   ;;  %v1388_v33 = vld [vmem:[#allocation5 + $0xa8] ss:$12 sps:$4 sm:$0xff]  }
  0x72   : > { %v397_v7 = vunpack.c.l.bf16 %v396_v4  ;;  %645 = vmatpush1.bf16.msra.mxu1 %v1364_v21  ;;  %v1380_v29 = vld [vmem:[#allocation5 + $0x78] ss:$12 sps:$4 sm:$0xff]   ;;  %v1361_v37 = vld [vmem:[#allocation5 + $0x8] ss:$12 sps:$4 sm:$0xff]   ;;  %v1365_v39 = vld [vmem:[#allocation5 + $0x20] ss:$12 sps:$4 sm:$0xff]  }
  0x73   : > { %646 = vmatprep.subr.bf16.mxu1 %v1366_v22  ;;  %v1386_v32 = vld [vmem:[#allocation5 + $0xac] ss:$12 sps:$4 sm:$0xff]   ;;  %v1373_v41 = vld [vmem:[#allocation5 + $0x50] ss:$12 sps:$4 sm:$0xff]   ;;  %v1377_v42 = vld [vmem:[#allocation5 + $0x68] ss:$12 sps:$4 sm:$0xff]  }
  0x74   : > { %v1369_v40 = vld [vmem:[#allocation5 + $0x38] ss:$12 sps:$4 sm:$0xff]   ;;  %v1381_v43 = vld [vmem:[#allocation5 + $0x80] ss:$12 sps:$4 sm:$0xff]   ;;  %v1389_v45 = vld [vmem:[#allocation5 + $0xb0] ss:$12 sps:$4 sm:$0xff]  }
  0x75   : > { %v1385_v44 = vld [vmem:[#allocation5 + $0x98] ss:$12 sps:$4 sm:$0xff]   ;;  %v1390_v48 = vld [vmem:[#allocation7] ss:$12 sps:$4 sm:$0xff]   ;;  %v1411_v49 = vld [vmem:[#allocation7 + $0x8] ss:$12 sps:$4 sm:$0xff]  }
  0x76   : > { %647 = vmatpush1.bf16.msra.mxu1 %v1368_v23  ;;  %v1395_v52 = vld [vmem:[#allocation7 + $0x1c] ss:$12 sps:$4 sm:$0xff]   ;;  %v1393_v55 = vld [vmem:[#allocation7 + $0x18] ss:$12 sps:$4 sm:$0xff]   ;;  %v1415_v56 = vld [vmem:[#allocation7 + $0x20] ss:$12 sps:$4 sm:$0xff]  }
  0x77   : > { %648 = vmatprep.subr.bf16.mxu1 %v1370_v24  ;;  %v1398_v57 = vld [vmem:[#allocation7 + $0x34] ss:$12 sps:$4 sm:$0xff]   ;;  %v1396_v58 = vld [vmem:[#allocation7 + $0x30] ss:$12 sps:$4 sm:$0xff]   ;;  %v1416_v59 = vld [vmem:[#allocation7 + $0x38] ss:$12 sps:$4 sm:$0xff]  }
  0x78   : > { %v1401_v60 = vld [vmem:[#allocation7 + $0x4c] ss:$12 sps:$4 sm:$0xff]   ;;  %v1399_v61 = vld [vmem:[#allocation7 + $0x48] ss:$12 sps:$4 sm:$0xff]   ;;  %v1417_v62 = vld [vmem:[#allocation7 + $0x50] ss:$12 sps:$4 sm:$0xff]  }
  0x79   : > { %v1404_v63 = vld [vmem:[#allocation7 + $0x64] ss:$12 sps:$4 sm:$0xff]   ;;  %v1418_v1 = vld [vmem:[#allocation7 + $0x68] ss:$12 sps:$4 sm:$0xff]   ;;  %v1419_v4 = vld [vmem:[#allocation7 + $0x80] ss:$12 sps:$4 sm:$0xff]  }
  0x7a   : > { %649 = vmatpush1.bf16.msra.mxu1 %v1372_v25  ;;  %v501_v20 = vsub.s32 0, %v500_v19  ;;  %v1174_v21 = vld [vmem:[%s1908_s7 + $0x1] ss:$2 sm:$0x7]  ;;  %v505_v22 = vsub.s32 1, %v500_v19  ;;  %s364_s20 = sand.u32 1, %s1582_s28  }
  0x7b   : > { %650 = vmatprep.subr.bf16.mxu1 %v1374_v26  ;;  %s1143_s12 = sshll.u32 %s364_s20, 3  ;;  %s1202_s29 = sshll.u32 %s1669_s9, 7 }
  0x7c   : > { %v762_v24 = vrot.slane %v1174_v21, %v501_v20  ;;  %v766_v26 = vrot.slane %v1174_v21, %v505_v22  ;;  %s366_s11 = scalar_lea.vmem [#allocation8], %s1143_s12  ;;  %s1859_s13 = scalar_lea.hbm %s1909_s8, %s1202_s29 }
  0x7d   : > { %s1019_s25 = sshll.u32 %s366_s11, 4  ;;  %s1006_s18 = scalar_lea.sflag [#allocation4], %s364_s20  ;;  %s1861_s25 = int_to_ptr.vmem [resolvable:$true] %s1019_s25 }
  0x7e   : > { %651 = vmatpush1.bf16.msra.mxu1 %v1376_v27  ;;  %s1520_s21 = scalar_lea.vmem %s1861_s25, 128  ;;  %p1935_p1 = scmp.ne.s32.totalorder %s1922_s15, 0 }
  0x7f   : > { %652 = vmatprep.subr.bf16.mxu1 %v1378_v28  ;;  %p1521_p12 = scmp.ne.s32.totalorder %s1861_s25, %s1520_s21  ;;  %s1602_s9 = smov [#allocation8]  }
  0x80   : > { %s1524_s19 = sshll.u32 %s1602_s9, 4  ;;  %s1525_s19 = int_to_ptr.vmem [resolvable:$false] %s1524_s19 }
  0x81   : > { %p1522_p2 = pnand %p1521_p12, %p1935_p1  ;;  %s1526_s22 = scalar_lea.vmem %s1525_s19, 256 }
  0x82   : > { %653 = vmatpush1.bf16.msra.mxu1 %v1380_v29  ;;  %p1527_p4 = scmp.lt.s32.totalorder %s1861_s25, %s1525_s19  ;;  %p1528_p7 = scmp.lt.s32.totalorder %s1526_s22, %s1520_s21 }
  0x83   : > { %654 = vmatprep.subr.bf16.mxu1 %v1382_v30  ;;  %p1523_p3 = pneg %p1522_p2 }
  0x84   : > { %p1529_p8 = por %p1528_p7, %p1527_p4 }
  0x86   : > { %655 = vmatpush1.bf16.msra.mxu1 %v1384_v31  ;;  %p1530_p11 = pnand %p1529_p8, %p1523_p3 }
  0x87   : > { %656 = vmatprep.subr.bf16.mxu1 %v1386_v32 }
  0x8a   : > { %657 = vmatpush1.bf16.msra.mxu1 %v1388_v33 }
  0x8b   : > { %902 = vmatprep.subr.bf16.mxu1 %v1392_v46 }
  0xf0   : > { %v385_v3 = vpop.permute.xlu0 %384 }
  0xf1   : > { %v393_v5 = vadd.f32 %v1147_v2, %v385_v3  ;;  %v1407_v2 = vld [vmem:[#allocation7 + $0x7c] ss:$12 sps:$4 sm:$0xff]   ;;  %v1405_v3 = vld [vmem:[#allocation7 + $0x78] ss:$12 sps:$4 sm:$0xff]  }
  0xf3   : > { %v394_v6 = vmul.f32 0.2, %v393_v5 }
  0xf5   : > { %v395_v8 = vmax.f32 %v393_v5, %v394_v6  ;;  %v1410_v5 = vld [vmem:[#allocation7 + $0x94] ss:$12 sps:$4 sm:$0xff]   ;;  %v1408_v6 = vld [vmem:[#allocation7 + $0x90] ss:$12 sps:$4 sm:$0xff]  }
  0xf7   : > { %v398_v9 = vadd.f32 %v397_v7, %v395_v8  ;;  %v1420_v7 = vld [vmem:[#allocation7 + $0x98] ss:$12 sps:$4 sm:$0xff]  }
  0xf8   : > { %v1414_v8 = vld [vmem:[#allocation7 + $0xac] ss:$12 sps:$4 sm:$0xff]  }
  0xf9   : > { %v400_v10 = vsel %vm399_vm0, %v398_v9, -inf }
  0xfa   : > { %401 = vmax.xlane.f32.xlu0 %v400_v10  ;;  %v1412_v10 = vld [vmem:[#allocation7 + $0xa8] ss:$12 sps:$4 sm:$0xff]  }
 0x187   : > { %v402_v11 = vpop.xlane.xlu0 %401 }
 0x188   : > { %v403_v12 = vsub.f32 %v398_v9, %v402_v11  ;;  %v1842_v9 = vld [vmem:[%s370_s23] sm:$0xff] }
 0x189   : > { %v1421_v11 = vld [vmem:[#allocation7 + $0xb0] ss:$12 sps:$4 sm:$0xff]  }
 0x18a   : > { %v404_v13 = vmul.f32 1.442695, %v403_v12  ;;  %v723_v12 = vpack.c.bf16 %v1842_v9, %v1842_v9 }
 0x18c   : > { %1422 = vpow2.f32 %v404_v13 }
 0x196   : > { %v1423_v14 = vpop.eup %1422 }
 0x197   : > { %v406_v15 = vsel %vm399_vm0, %v1423_v14, 0.0 }
 0x198   : > { %407 = vadd.xlane.f32.xlu1 %v406_v15 }
 0x225   : > { %v408_v34 = vpop.xlane.xlu1 %407 }
 0x226   : > { %1424 = vrcp.f32 %v408_v34 }
 0x230   : > { %v1425_v35 = vpop.eup %1424 }
 0x231   : > { %v410_v36 = vmul.f32 %v1425_v35, %v1423_v14 }
 0x233   : > { %v411_v38 = vpack.c.bf16 %v410_v36, %v410_v36 }
 0x235   : > { %1228 = vmatmul.mubr.msk.bf16.vlgmr.msra.gmra.mrb[0].mxu0 %vm399_vm0, %v411_v38 }
 0x236   : > { %1232 = vmatpush3.bf16.msra.mxu0 %v1361_v37  ;;  %1247 = vmatprep.mubr.msk.bf16.mxu0 %vm1601_vm1, %v1600_v17 }
 0x237   : > { %1233 = vmatprep.subr.bf16.mxu0 %v1600_v17 }
 0x23a   : > { %1234 = vmatpush3.bf16.msra.mxu0 %v1365_v39 }
 0x23b   : > { %1235 = vmatprep.subr.bf16.mxu0 %v1600_v17 }
 0x23e   : > { %1236 = vmatpush3.bf16.msra.mxu0 %v1369_v40 }
 0x23f   : > { %1237 = vmatprep.subr.bf16.mxu0 %v1600_v17 }
 0x242   : > { %1238 = vmatpush3.bf16.msra.mxu0 %v1373_v41 }
 0x243   : > { %1239 = vmatprep.subr.bf16.mxu0 %v1600_v17 }
 0x246   : > { %1240 = vmatpush3.bf16.msra.mxu0 %v1377_v42 }
 0x247   : > { %1241 = vmatprep.subr.bf16.mxu0 %v1600_v17 }
 0x24a   : > { %1242 = vmatpush3.bf16.msra.mxu0 %v1381_v43  ;;  %v509_v43 = vsub.s32 2, %v500_v19 }
 0x24b   : > { %1243 = vmatprep.subr.bf16.mxu0 %v1600_v17 }
 0x24e   : > { %1244 = vmatpush3.bf16.msra.mxu0 %v1385_v44  ;;  %v770_v44 = vrot.slane %v1174_v21, %v509_v43 }
 0x24f   : > { %1245 = vmatprep.subr.bf16.mxu0 %v1600_v17 }
 0x252   : > { %1246 = vmatpush3.bf16.msra.mxu0 %v1389_v45 }
 0x253   : > { %1251 = vmatprep.subr.bf16.mxu0 %v1600_v17 }
 0x308   : > { %v457_v47 = vpop.f32.mrb[0].mxu0 }
 0x309   : > { %v464_v50 = vpack.c.bf16 %v457_v47, %v457_v47  ;;  %v1229_v51 = vpop.f32.mrb[1].mxu0 }
 0x30a   : > { %v460_v53 = vpop.f32.mrb[2].mxu0 }
 0x30b   : > { %v1230_v54 = vpop.f32.mrb[3].mxu0  ;;  %675 = vmatmul.mubr.bf16.vlgmr.msra.gmra.mrb[0].mxu1 %v464_v50  ;;  %1248 = vmatmul.mubr.bf16.vlgmr.msra.gmra.mrb[4].mxu0 %v464_v50 }
 0x30c   : > { %903 = vmatpush1.bf16.msra.mxu1 %v1390_v48  ;;  %1252 = vmatpush3.bf16.msra.mxu0 %v1411_v49 }
 0x30d   : > { %904 = vmatprep.subr.bf16.mxu1 %v1395_v52  ;;  %1253 = vmatprep.subr.bf16.mxu0 %v1600_v17 }
 0x30e   : > { %934 = vmatprep.mubr.bf16.mxu1 %v1599_v0  ;;  %1267 = vmatprep.mubr.msk.bf16.mxu0 %vm1601_vm1, %v1600_v17  ;;  %v1402_v0 = vld [vmem:[#allocation7 + $0x60] ss:$12 sps:$4 sm:$0xff]  }
 0x310   : > { %905 = vmatpush1.bf16.msra.mxu1 %v1393_v55  ;;  %1254 = vmatpush3.bf16.msra.mxu0 %v1415_v56 }
 0x311   : > { %906 = vmatprep.subr.bf16.mxu1 %v1398_v57  ;;  %1255 = vmatprep.subr.bf16.mxu0 %v1600_v17 }
 0x314   : > { %907 = vmatpush1.bf16.msra.mxu1 %v1396_v58  ;;  %1256 = vmatpush3.bf16.msra.mxu0 %v1416_v59 }
 0x315   : > { %908 = vmatprep.subr.bf16.mxu1 %v1401_v60  ;;  %1257 = vmatprep.subr.bf16.mxu0 %v1600_v17 }
 0x318   : > { %909 = vmatpush1.bf16.msra.mxu1 %v1399_v61  ;;  %1258 = vmatpush3.bf16.msra.mxu0 %v1417_v62 }
 0x319   : > { %910 = vmatprep.subr.bf16.mxu1 %v1404_v63  ;;  %1259 = vmatprep.subr.bf16.mxu0 %v1600_v17 }
 0x31c   : > { %911 = vmatpush1.bf16.msra.mxu1 %v1402_v0  ;;  %1260 = vmatpush3.bf16.msra.mxu0 %v1418_v1 }
 0x31d   : > { %912 = vmatprep.subr.bf16.mxu1 %v1407_v2  ;;  %1261 = vmatprep.subr.bf16.mxu0 %v1600_v17 }
 0x320   : > { %913 = vmatpush1.bf16.msra.mxu1 %v1405_v3  ;;  %1262 = vmatpush3.bf16.msra.mxu0 %v1419_v4 }
 0x321   : > { %914 = vmatprep.subr.bf16.mxu1 %v1410_v5  ;;  %1263 = vmatprep.subr.bf16.mxu0 %v1600_v17 }
 0x324   : > { %915 = vmatpush1.bf16.msra.mxu1 %v1408_v6  ;;  %1264 = vmatpush3.bf16.msra.mxu0 %v1420_v7 }
 0x325   : > { %916 = vmatprep.subr.bf16.mxu1 %v1414_v8  ;;  %1265 = vmatprep.subr.bf16.mxu0 %v1600_v17  ;;  %v497_v17 = vld [vmem:[%s1908_s7] ss:$2 sm:$0x7] }
 0x326   : > { %v502_v23 = vrot.slane %v497_v17, %v501_v20  ;;  %v506_v25 = vrot.slane %v497_v17, %v505_v22  ;;  %v510_v46 = vrot.slane %v497_v17, %v509_v43 }
 0x328   : > { %917 = vmatpush1.bf16.msra.mxu1 %v1412_v10  ;;  %1266 = vmatpush3.bf16.msra.mxu0 %v1421_v11  ;;  %v1271_v27 = vadd.f32 %v762_v24, %v502_v23  ;;  %v1273_v29 = vadd.f32 %v766_v26, %v506_v25 }
 0x32b   : > { %935 = vmatmul.mubr.bf16.vlgmr.msra.gmra.mrb[0].mxu1 %v723_v12  ;;  %1268 = vmatmul.mubr.bf16.vlgmr.msra.gmra.mrb[8].mxu0 %v723_v12 }
 0x3de   : > { %v717_v13 = vpop.f32.mrb[4].mxu0 }
 0x3df   : > { %v1249_v14 = vpop.f32.mrb[5].mxu0  ;;  %v718_v50 = vadd.f32 %v717_v13, %v510_v46 }
 0x3e0   : > { %v720_v15 = vpop.f32.mrb[6].mxu0 }
 0x3e1   : > { %v1250_v16 = vpop.f32.mrb[7].mxu0 }
 0x3fe   : > { %v936_v28 = vpop.f32.mrb[0].mxu1  ;;  %v977_v30 = vpop.f32.mrb[8].mxu0 }
 0x3ff   : > { %v1272_v31 = vadd.f32 %v1271_v27, %v936_v28  ;;  %v938_v32 = vpop.f32.mrb[1].mxu1  ;;  %v1269_v33 = vpop.f32.mrb[9].mxu0  ;;  %v978_v48 = vadd.f32 %v977_v30, %v770_v44 }
 0x400   : > { %v940_v34 = vpop.f32.mrb[2].mxu1  ;;  %v980_v35 = vpop.f32.mrb[10].mxu0  ;;  %v1274_v39 = vadd.f32 %v1273_v29, %v938_v32 }
 0x401   : > { %v1199_v36 = vmul.f32 -1.442695, %v1272_v31  ;;  %v941_v37 = vpop.f32.mrb[3].mxu1  ;;  %v1270_v38 = vpop.f32.mrb[11].mxu0 }
 0x402   : > { %v1200_v40 = vmul.f32 -1.442695, %v1274_v39 }
 0x403   : > { %1426 = vpow2.f32 %v1199_v36 }
 0x404   : > { %1428 = vpow2.f32 %v1200_v40 }
 0x40d   : > { %v1427_v41 = vpop.eup %1426 }
 0x40e   : > { %v991_v42 = vadd.f32 1.0, %v1427_v41  ;;  %v1429_v45 = vpop.eup %1428 }
 0x40f   : > { %v992_v47 = vadd.f32 1.0, %v1429_v45 }
 0x410   : > { %1430 = vrcp.f32 %v991_v42 }
 0x411   : > { %1432 = vrcp.f32 %v992_v47 }
 0x41a   : > { %v1431_v49 = vpop.eup %1430 }
 0x41b   : > { %v997_v51 = vmul.f32 %v1431_v49, %v978_v48  ;;  %v1433_v53 = vpop.eup %1432 }
 0x41c   : > { %v1000_v54 = vsub.f32 1.0, %v1433_v53  ;;  %v1002_v57 = vmul.f32 %v1433_v53, %v1842_v9 }
 0x41d   : > { %v998_v52 = vadd.f32 %v997_v51, %v718_v50 }
 0x41f   : > { %1434 = vtanh.f32 %v998_v52 }
 0x429   : > { %v1435_v55 = vpop.eup %1434 }
 0x42a   : > { %v1001_v56 = vmul.f32 %v1435_v55, %v1000_v54 }
 0x42c   : > { %v1003_v58 = vadd.f32 %v1002_v57, %v1001_v56 }
 0x42e   : > { %1004 = vst [vmem:[%s366_s11] sm:$0xff] %v1003_v58 }
 0x42f   : > { %1533 = shalt.err (!%p1530_p11)
}
 0x430   : > { %s1534_s23 = scalar_lea.hbm %s1859_s13, 128  ;;  %s1538_s24 = scalar_lea.hbm %s1909_s8, 256 }
 0x431   : > { %p1535_p5 = scmp.ne.s32.totalorder %s1859_s13, %s1534_s23  ;;  %p1539_p9 = scmp.lt.u32.totalorder %s1859_s13, %s1909_s8 }
 0x432   : > { %p1540_p10 = scmp.lt.u32.totalorder %s1538_s24, %s1534_s23  ;;  %p1542_p12 = scmp.lt.u32.totalorder %s1534_s23, %s1859_s13 }
 0x433   : > { %p1536_p0 = pnand %p1535_p5, %p1935_p1 }
 0x434   : > { %p1541_p13 = por %p1540_p10, %p1539_p9 }
 0x435   : > { %p1537_p6 = pneg %p1536_p0 }
 0x436   : > { %p1543_p2 = por %p1542_p12, %p1541_p13 }
 0x438   : > { %p1544_p3 = pnand %p1543_p2, %p1537_p6 }
 0x43a   : > { %1547 = shalt.err (!%p1544_p3)
}
 0x43b   : > { %1291 = dma.vmem_to_hbm [thread:$0]  (%p1935_p1), %s1861_s25, 128, %s1859_s13, %s1006_s18  }
 0x43c PF: > { %p1313_p4 = scmp.ge.s32.totalorder %s1590_s30, 2  ;;  %s1031_s12 = sand.u32 1, %s1578_s27  }
 0x43d   : > { %p1936_p7 = scmp.ne.s32.totalorder %s1923_s16, 0  ;;  %s1032_s29 = scalar_lea.sflag [#allocation4], %s1031_s12 }
 0x43f   : > { %p1304_p8 = pnand %p1313_p4, %p1936_p7 }
 0x441   : > { %1573 = dma.done.wait (!%p1304_p8), %s1032_s29, 128  }
 0x442   : > { %1575 = vsyncadd (!%p1304_p8), %s1032_s29, 4294967168  ;;  %s1937_s30 = sld [smem:[#allocation13_spill]]  ;;  %s1938_s11 = sld [smem:[#allocation12_spill]] }
 0x443   : > { %s1939_s29 = sld [smem:[#allocation14_spill]]  ;;  %s1940_s27 = smov %s1582_s28 }
 0x448   : > { %p20_p11 = scmp.ge.s32.totalorder %s1937_s30, 4   ;;  %s1941_s28 = smov %s1938_s11 }
 0x44a   :  { %22 = sbr.rel (!%p20_p11) target bundleno = 7 (0x7), region = 107 }
 0x451   :  { %1037 = vsyncpa [#allocation3], 1 }
 0x452   :  { %1039 = vsyncpa [#allocation3 + $0x1], 1 }
 0x453   :  { %1040 = vsyncpa [#allocation6], 1 }
 0x454   :  { %1041 = vsyncpa [#allocation4], 1 }
 0x455   :  { %1043 = vsyncpa [#allocation4 + $0x1], 1 }

</bundles_post_ra>
